<compile_context>
chip_gen: v6e
topology: v6e:2x2x1
jax: 0.10.0
libtpu: 0.0.40
codegen_flags: <defaults>
</compile_context>

<pallas_src>
import jax
import jax.numpy as jnp
from jax.experimental import pallas as pl
from jax.experimental.pallas import tpu as pltpu


def belief_net_kernel(x_ref, w1_ref, b1_ref, w2_ref, b2_ref,
                      hw_ref, hb_ref, out_ref):
    # Trunk: Linear -> ReLU -> Linear -> ReLU  (MXU matmuls, f32 accumulation)
    x = x_ref[...]                                                  # [TB, D_in]
    h = jnp.dot(x, w1_ref[...], preferred_element_type=jnp.float32)
    h = jnp.maximum(h + b1_ref[...], 0.0)                           # [TB, H]
    h = jnp.dot(h, w2_ref[...], preferred_element_type=jnp.float32)
    h = jnp.maximum(h + b2_ref[...], 0.0)                           # [TB, H]

    # All 4 heads fused into one matmul: [TB, H] @ [H, 4*n_actions].
    logits = jnp.dot(h, hw_ref[...], preferred_element_type=jnp.float32)
    out_ref[...] = logits + hb_ref[...]                             # [TB, 4*NA]


def belief_net_forward(x, params, *, batch_tile=256):
    """x: [B, input_dim] float32. Returns list of 4 arrays [B, n_actions]."""
    w1, b1, w2, b2 = params["w1"], params["b1"], params["w2"], params["b2"]
    hw, hb = params["head_w"], params["head_b"]      # [H, 4*NA], [1, 4*NA]

    B, D = x.shape
    H = w1.shape[1]
    NA4 = hw.shape[1]                                # 4 * n_actions
    n_heads = 4
    n_actions = NA4 // n_heads

    # Batch tiling: one tile at small B; parallel grid (both TCs on v7x) at
    # large B.  Tile sizes are multiples of 8 (sublane) by construction.
    TB = B if B <= batch_tile else batch_tile
    Bp = pl.cdiv(B, TB) * TB
    x_in = x if Bp == B else jnp.pad(x, ((0, Bp - B), (0, 0)))
    grid = (Bp // TB,)

    flops = 2 * Bp * (D * H + H * H + H * NA4)
    bytes_accessed = 4 * (Bp * D + D * H + H + H * H + H
                          + H * NA4 + NA4 + Bp * NA4)

    out = pl.pallas_call(
        belief_net_kernel,
        out_shape=jax.ShapeDtypeStruct((Bp, NA4), jnp.float32),
        grid_spec=pltpu.PrefetchScalarGridSpec(
            num_scalar_prefetch=0,
            grid=grid,
            in_specs=[
                pl.BlockSpec((TB, D), lambda i: (i, 0)),    # x: tiled on batch
                pl.BlockSpec((D, H), lambda i: (0, 0)),     # w1: resident
                pl.BlockSpec((1, H), lambda i: (0, 0)),     # b1: resident
                pl.BlockSpec((H, H), lambda i: (0, 0)),     # w2: resident
                pl.BlockSpec((1, H), lambda i: (0, 0)),     # b2: resident
                pl.BlockSpec((H, NA4), lambda i: (0, 0)),   # fused head W
                pl.BlockSpec((1, NA4), lambda i: (0, 0)),   # fused head b
            ],
            out_specs=pl.BlockSpec((TB, NA4), lambda i: (i, 0)),
        ),
        compiler_params=pltpu.CompilerParams(
            dimension_semantics=("parallel",),
            vmem_limit_bytes=32 * 1024 * 1024,
        ),
        cost_estimate=pl.CostEstimate(
            flops=flops, transcendentals=0, bytes_accessed=bytes_accessed),
    )(x_in, w1, b1, w2, b2, hw, hb)

    out = out[:B]  # drop batch padding (no-op when Bp == B)
    # BeliefNet.forward returns a Python list of per-head logits
    # (lane slices on the fused [B, 4*n_actions] slab).
    return [out[:, k * n_actions:(k + 1) * n_actions] for k in range(n_heads)]


def init_params(key, input_dim, hidden_dim, n_actions):
    """Deterministic PyTorch-Linear-style init (uniform +-1/sqrt(fan_in))."""
    ks = jax.random.split(key, 6)

    def lin(kw, kb, fan_in, fan_out):
        bound = 1.0 / (fan_in ** 0.5)
        w = jax.random.uniform(kw, (fan_in, fan_out), jnp.float32, -bound, bound)
        b = jax.random.uniform(kb, (fan_out,), jnp.float32, -bound, bound)
        return w, b

    w1, b1 = lin(ks[0], ks[1], input_dim, hidden_dim)
    w2, b2 = lin(ks[2], ks[3], hidden_dim, hidden_dim)

    # 4 heads, fused along the output (lane) axis: [H, 4*n_actions].
    bound = 1.0 / (hidden_dim ** 0.5)
    head_w = jax.random.uniform(ks[4], (hidden_dim, 4 * n_actions),
                                jnp.float32, -bound, bound)
    head_b = jax.random.uniform(ks[5], (1, 4 * n_actions),
                                jnp.float32, -bound, bound)

    return {
        "w1": w1, "b1": b1[None, :],      # biases kept 2-D for TPU layout
        "w2": w2, "b2": b2[None, :],
        "head_w": head_w, "head_b": head_b,
    }


def reference_forward(x, params, n_actions):
    """Pure-JAX reference with per-head matmuls (same math as BeliefNet)."""
    h = jnp.maximum(x @ params["w1"] + params["b1"], 0.0)
    h = jnp.maximum(h @ params["w2"] + params["b2"], 0.0)
    outs = []
    for k in range(4):
        wk = params["head_w"][:, k * n_actions:(k + 1) * n_actions]
        bk = params["head_b"][0, k * n_actions:(k + 1) * n_actions]
        outs.append(h @ wk + bk)
    return outs


# TODO(synk): optimizer (Adam), CrossEntropyLoss, save/load checkpointing and
# predict_actions' argmax host glue are training/IO utilities outside the
# forward pass and are not translated to Pallas.

if __name__ == "__main__":
    # config = {'input_dim': 32, 'hidden_dim': 32, 'output_dim': 4, ...}
    B, input_dim, hidden_dim, n_actions = 8, 32, 32, 4

    key = jax.random.PRNGKey(0)
    k_params, k_x = jax.random.split(key)
    params = init_params(k_params, input_dim, hidden_dim, n_actions)
    x = jax.random.normal(k_x, (B, input_dim), jnp.float32)

    outs = belief_net_forward(x, params)
    outs = [jax.block_until_ready(o) for o in outs]

    refs = reference_forward(x, params, n_actions)
    for o, r in zip(outs, refs):
        assert o.shape == (B, n_actions)
        assert jnp.allclose(o, r, atol=1e-5, rtol=1e-5)

    print("KERNEL_OK")
</pallas_src>

<mosaic_0001>
module attributes {stable_mosaic.version = 11 : i64} {
  func.func @belief_net_kernel(%arg0: i32, %arg1: memref<8x32xf32, #tpu.memory_space<vmem>>, %arg2: memref<32x32xf32, #tpu.memory_space<vmem>>, %arg3: memref<1x32xf32, #tpu.memory_space<vmem>>, %arg4: memref<32x32xf32, #tpu.memory_space<vmem>>, %arg5: memref<1x32xf32, #tpu.memory_space<vmem>>, %arg6: memref<32x16xf32, #tpu.memory_space<vmem>>, %arg7: memref<1x16xf32, #tpu.memory_space<vmem>>, %arg8: memref<8x16xf32, #tpu.memory_space<vmem>>) attributes {dimension_semantics = [#tpu.dimension_semantics<parallel>], iteration_bounds = array<i64: 1>, scalar_prefetch = 0 : i64, scratch_operands = 0 : i64, tpu.core_type = #tpu.core_type<tc>, window_params = [{transform_indices = @transform_0, window_bounds = array<i64: 8, 32>}, {pipeline_mode = #tpu.pipeline_mode<synchronous>, transform_indices = @transform_1, window_bounds = array<i64: 32, 32>}, {pipeline_mode = #tpu.pipeline_mode<synchronous>, transform_indices = @transform_2, window_bounds = array<i64: 1, 32>}, {pipeline_mode = #tpu.pipeline_mode<synchronous>, transform_indices = @transform_3, window_bounds = array<i64: 32, 32>}, {pipeline_mode = #tpu.pipeline_mode<synchronous>, transform_indices = @transform_4, window_bounds = array<i64: 1, 32>}, {pipeline_mode = #tpu.pipeline_mode<synchronous>, transform_indices = @transform_5, window_bounds = array<i64: 32, 16>}, {pipeline_mode = #tpu.pipeline_mode<synchronous>, transform_indices = @transform_6, window_bounds = array<i64: 1, 16>}, {transform_indices = @transform_7, window_bounds = array<i64: 8, 16>}]} {
    %c0 = arith.constant 0 : index
    %c0_0 = arith.constant 0 : index
    %0 = vector.load %arg1[%c0, %c0_0] : memref<8x32xf32, #tpu.memory_space<vmem>>, vector<8x32xf32>
    %c0_1 = arith.constant 0 : index
    %c0_2 = arith.constant 0 : index
    %1 = vector.load %arg2[%c0_1, %c0_2] : memref<32x32xf32, #tpu.memory_space<vmem>>, vector<32x32xf32>
    %cst = arith.constant dense<0.000000e+00> : vector<8x32xf32>
    %2 = tpu.matmul %0, %1, %cst {dimension_numbers = #tpu.dot_dimension_numbers<[1], [0], [0], [1], [0, 0, 1, 1], [], []>} : vector<8x32xf32>, vector<32x32xf32>, vector<8x32xf32> -> vector<8x32xf32>
    %c0_3 = arith.constant 0 : index
    %c0_4 = arith.constant 0 : index
    %3 = vector.load %arg3[%c0_3, %c0_4] : memref<1x32xf32, #tpu.memory_space<vmem>>, vector<1x32xf32>
    %4 = vector.broadcast %3 : vector<1x32xf32> to vector<8x32xf32>
    %5 = arith.addf %2, %4 : vector<8x32xf32>
    %cst_5 = arith.constant 0.000000e+00 : f32
    %6 = vector.broadcast %cst_5 : f32 to vector<8x32xf32>
    %7 = arith.maximumf %5, %6 : vector<8x32xf32>
    %c0_6 = arith.constant 0 : index
    %c0_7 = arith.constant 0 : index
    %8 = vector.load %arg4[%c0_6, %c0_7] : memref<32x32xf32, #tpu.memory_space<vmem>>, vector<32x32xf32>
    %cst_8 = arith.constant dense<0.000000e+00> : vector<8x32xf32>
    %9 = tpu.matmul %7, %8, %cst_8 {dimension_numbers = #tpu.dot_dimension_numbers<[1], [0], [0], [1], [0, 0, 1, 1], [], []>} : vector<8x32xf32>, vector<32x32xf32>, vector<8x32xf32> -> vector<8x32xf32>
    %c0_9 = arith.constant 0 : index
    %c0_10 = arith.constant 0 : index
    %10 = vector.load %arg5[%c0_9, %c0_10] : memref<1x32xf32, #tpu.memory_space<vmem>>, vector<1x32xf32>
    %11 = vector.broadcast %10 : vector<1x32xf32> to vector<8x32xf32>
    %12 = arith.addf %9, %11 : vector<8x32xf32>
    %cst_11 = arith.constant 0.000000e+00 : f32
    %13 = vector.broadcast %cst_11 : f32 to vector<8x32xf32>
    %14 = arith.maximumf %12, %13 : vector<8x32xf32>
    %c0_12 = arith.constant 0 : index
    %c0_13 = arith.constant 0 : index
    %15 = vector.load %arg6[%c0_12, %c0_13] : memref<32x16xf32, #tpu.memory_space<vmem>>, vector<32x16xf32>
    %cst_14 = arith.constant dense<0.000000e+00> : vector<8x16xf32>
    %16 = tpu.matmul %14, %15, %cst_14 {dimension_numbers = #tpu.dot_dimension_numbers<[1], [0], [0], [1], [0, 0, 1, 1], [], []>} : vector<8x32xf32>, vector<32x16xf32>, vector<8x16xf32> -> vector<8x16xf32>
    %c0_15 = arith.constant 0 : index
    %c0_16 = arith.constant 0 : index
    %17 = vector.load %arg7[%c0_15, %c0_16] : memref<1x16xf32, #tpu.memory_space<vmem>>, vector<1x16xf32>
    %18 = vector.broadcast %17 : vector<1x16xf32> to vector<8x16xf32>
    %19 = arith.addf %16, %18 : vector<8x16xf32>
    %c0_17 = arith.constant 0 : index
    %c0_18 = arith.constant 0 : index
    %20 = vector.load %arg8[%c0_17, %c0_18] : memref<8x16xf32, #tpu.memory_space<vmem>>, vector<8x16xf32>
    tpu.vector_store %arg8[%c0_17, %c0_18], %19 {strides = array<i32>} : memref<8x16xf32, #tpu.memory_space<vmem>>, vector<8x16xf32>,
    return
  }
  func.func @transform_0(%arg0: i32) -> (i32, i32) {
    %c0_i32 = arith.constant 0 : i32
    %c0_i32_0 = arith.constant 0 : i32
    return %arg0, %c0_i32 : i32, i32
  }
  func.func @transform_1(%arg0: i32) -> (i32, i32) {
    %c0_i32 = arith.constant 0 : i32
    %c0_i32_0 = arith.constant 0 : i32
    %c0_i32_1 = arith.constant 0 : i32
    return %c0_i32, %c0_i32_0 : i32, i32
  }
  func.func @transform_2(%arg0: i32) -> (i32, i32) {
    %c0_i32 = arith.constant 0 : i32
    %c0_i32_0 = arith.constant 0 : i32
    %c0_i32_1 = arith.constant 0 : i32
    return %c0_i32, %c0_i32_0 : i32, i32
  }
  func.func @transform_3(%arg0: i32) -> (i32, i32) {
    %c0_i32 = arith.constant 0 : i32
    %c0_i32_0 = arith.constant 0 : i32
    %c0_i32_1 = arith.constant 0 : i32
    return %c0_i32, %c0_i32_0 : i32, i32
  }
  func.func @transform_4(%arg0: i32) -> (i32, i32) {
    %c0_i32 = arith.constant 0 : i32
    %c0_i32_0 = arith.constant 0 : i32
    %c0_i32_1 = arith.constant 0 : i32
    return %c0_i32, %c0_i32_0 : i32, i32
  }
  func.func @transform_5(%arg0: i32) -> (i32, i32) {
    %c0_i32 = arith.constant 0 : i32
    %c0_i32_0 = arith.constant 0 : i32
    %c0_i32_1 = arith.constant 0 : i32
    return %c0_i32, %c0_i32_0 : i32, i32
  }
  func.func @transform_6(%arg0: i32) -> (i32, i32) {
    %c0_i32 = arith.constant 0 : i32
    %c0_i32_0 = arith.constant 0 : i32
    %c0_i32_1 = arith.constant 0 : i32
    return %c0_i32, %c0_i32_0 : i32, i32
  }
  func.func @transform_7(%arg0: i32) -> (i32, i32) {
    %c0_i32 = arith.constant 0 : i32
    %c0_i32_0 = arith.constant 0 : i32
    return %arg0, %c0_i32 : i32, i32
  }
}

</mosaic_0001>

<bundles_post_ra>
// kernel: tpu_custom_call.1
= control target key start
LH: loop header
LB: loop body
LE: loop exit
PB: predicated region body
PF: predicated region fallthrough
CT: control target
= control target key end

     0   :  { %12 = vsyncpa [#allocation3], 0  ;;  %s512_s0 = inlined_call_operand.vmem [shape: f32[8,32], index: 0, kind: input, shape index: {}]   ;;  %s513_s1 = inlined_call_operand.vmem [shape: f32[32,32], index: 1, kind: input, shape index: {}]   ;;  %s514_s2 = inlined_call_operand.vmem [shape: f32[1,32], index: 2, kind: input, shape index: {}]   ;;  %s515_s3 = inlined_call_operand.hbm [shape: f32[32,32], index: 3, kind: input, shape index: {}]   ;;  %s516_s4 = inlined_call_operand.vmem [shape: f32[1,32], index: 4, kind: input, shape index: {}]   ;;  %s517_s5 = inlined_call_operand.vmem [shape: f32[32,16], index: 5, kind: input, shape index: {}]   ;;  %s518_s6 = inlined_call_operand.vmem [shape: f32[1,16], index: 6, kind: input, shape index: {}]   ;;  %s519_s7 = inlined_call_operand.hbm [shape: f32[8,16], index: 7, kind: output, shape index: {}]  }
   0x1   :  { %13 = vsyncpa [#allocation4], 0  ;;  %s418_s24 = smov [#allocation2]  }
   0x2   :  { %s25_s25 = sshll.u32 %s418_s24, 4  ;;  %s26_s25 = int_to_ptr.vmem [resolvable:$true] %s25_s25 }
   0x3   :  { %s382_s26 = scalar_lea.vmem %s26_s25, 512  ;;  %p387_p1 = scmp.lt.s32.totalorder %s26_s25, %s26_s25 }
   0x4   :  { %p383_p0 = scmp.ne.s32.totalorder %s26_s25, %s382_s26  ;;  %p388_p2 = scmp.lt.s32.totalorder %s382_s26, %s382_s26 }
   0x6   :  { %p389_p3 = por %p388_p2, %p387_p1 }
   0x8   :  { %p390_p4 = pnand %p389_p3, %p383_p0 }
   0xa   :  { %393 = shalt.err (!%p390_p4)
}
   0xb   :  { %s419_s27 = smov 128   ;;  %s420_s28 = smov 8  }
   0xc   :  { %31 = dma.hbm_to_vmem [thread:$0]  %s515_s3, 512, %s26_s25, [#allocation3], %s419_s27, %s419_s27, %s420_s28  }
   0xd   :  { %414 = dma.done.wait [#allocation3], 512  }
   0xe   :  { %415 = vsyncadd [#allocation3], 4294966784  ;;  %v421_v0 = vmov 0.0   ;;  %vm422_vm0 = vmmov 0   ;;  %v45_v1 = vld [vmem:[%s513_s1 + $0x18] sm:$0xff]  ;;  %v44_v2 = vld [vmem:[%s513_s1 + $0x10] sm:$0xff] }
   0xf   :  { %335 = vmatprep.subr.mxu0 %v421_v0  ;;  %343 = vmatprep.mubr.msk.f32.mxu0 %vm422_vm0, %v421_v0  ;;  %v131_v3 = vld [vmem:[#allocation2 + $0x18] sm:$0xff]  ;;  %v43_v4 = vld [vmem:[%s513_s1 + $0x8] sm:$0xff]  ;;  %v42_v5 = vld [vmem:[%s513_s1] sm:$0xff]  ;;  %vm53_vm1 = vcmask 261120   ;;  %s423_s28 = smov [#allocation5]   ;;  %vm297_vm2 = vcmask 130048  }
  0x10   :  { %346 = vmatprep.subr.mxu1 %v421_v0  ;;  %354 = vmatprep.mubr.msk.f32.mxu1 %vm422_vm0, %v421_v0  ;;  %v41_v6 = vld [vmem:[%s512_s0] sm:$0xff]  ;;  %v130_v7 = vld [vmem:[#allocation2 + $0x10] sm:$0xff]  ;;  %v129_v8 = vld [vmem:[#allocation2 + $0x8] sm:$0xff]  ;;  %s305_s29 = sshll.u32 %s423_s28, 4  ;;  %s306_s29 = int_to_ptr.vmem [resolvable:$true] %s305_s29 }
  0x11   :  { %336 = vmatpush3.msra.mxu0 %v45_v1  ;;  %347 = vmatpush3.msra.mxu1 %v131_v3  ;;  %v128_v9 = vld [vmem:[#allocation2] sm:$0xff]  ;;  %v216_v10 = vld [vmem:[%s517_s5 + $0x18] sm:$0xff]  ;;  %v215_v16 = vld [vmem:[%s517_s5 + $0x10] sm:$0xff]  ;;  %p399_p6 = scmp.lt.s32.totalorder %s306_s29, %s306_s29 }
  0x12   :  { %337 = vmatprep.subr.mxu0 %v421_v0  ;;  %348 = vmatprep.subr.mxu1 %v421_v0  ;;  %v314_v11 = vld [vmem:[%s514_s2] ss:$0 sm:$0xff]  ;;  %v214_v17 = vld [vmem:[%s517_s5 + $0x8] sm:$0xff] }
  0x13   :  { %338 = vmatpush3.msra.mxu0 %v44_v2  ;;  %349 = vmatpush3.msra.mxu1 %v130_v7  ;;  %v213_v18 = vld [vmem:[%s517_s5] sm:$0xff]  ;;  %s394_s5 = scalar_lea.vmem %s306_s29, 128 }
  0x14   :  { %339 = vmatprep.subr.mxu0 %v421_v0  ;;  %350 = vmatprep.subr.mxu1 %v421_v0  ;;  %v316_v19 = vld [vmem:[%s516_s4] ss:$0 sm:$0xff]  ;;  %p395_p5 = scmp.ne.s32.totalorder %s306_s29, %s394_s5  ;;  %p400_p7 = scmp.lt.s32.totalorder %s394_s5, %s394_s5 }
  0x15   :  { %340 = vmatpush3.msra.mxu0 %v43_v4  ;;  %351 = vmatpush3.msra.mxu1 %v129_v8  ;;  %v318_v24 = vld [vmem:[%s518_s6] ss:$0 sm:$0xff] }
  0x16   :  { %341 = vmatprep.subr.mxu0 %v421_v0  ;;  %352 = vmatprep.subr.mxu1 %v421_v0  ;;  %p401_p8 = por %p400_p7, %p399_p6 }
  0x17   :  { %342 = vmatpush3.msra.mxu0 %v42_v5  ;;  %353 = vmatpush3.msra.mxu1 %v128_v9 }
  0x18   :  { %344 = vmatmul.mubr.msk.f32.vlgmr.msra.gmra.mxu0 %vm53_vm1, %v41_v6  ;;  %357 = vmatprep.subr.mxu0 %v421_v0  ;;  %p402_p9 = pnand %p401_p8, %p395_p5 }
  0x19   :  { %365 = vmatprep.mubr.msk.f32.mxu0 %vm422_vm0, %v421_v0  ;;  %358 = vmatpush3.msra.mxu0 %v216_v10 }
  0x1a   :  { %359 = vmatprep.subr.mxu0 %v421_v0 }
  0x1b   :  { %360 = vmatpush3.msra.mxu0 %v215_v16 }
  0x1c   :  { %361 = vmatprep.subr.mxu0 %v421_v0 }
  0x1d   :  { %362 = vmatpush3.msra.mxu0 %v214_v17 }
  0x1e   :  { %363 = vmatprep.subr.mxu0 %v421_v0 }
  0x1f   :  { %364 = vmatpush3.msra.mxu0 %v213_v18 }
  0xd8   :  { %v123_v12 = vpop.f32.mrf.mxu0 }
  0xd9   :  { %v124_v13 = vadd.f32 %v314_v11, %v123_v12 }
  0xda   :  { %v345_v14 = vpop.f32.mrf.mxu0 }
  0xdb   :  { %v127_v15 = vmax.f32 %v124_v13, 0.0 }
  0xdd   :  { %355 = vmatmul.mubr.msk.f32.vlgmr.msra.gmra.mxu1 %vm53_vm1, %v127_v15 }
 0x19d   :  { %v208_v20 = vpop.f32.mrf.mxu1 }
 0x19e   :  { %v209_v21 = vadd.f32 %v316_v19, %v208_v20 }
 0x19f   :  { %v356_v22 = vpop.f32.mrf.mxu1 }
 0x1a0   :  { %v212_v23 = vmax.f32 %v209_v21, 0.0 }
 0x1a2   :  { %366 = vmatmul.mubr.msk.f32.vlgmr.msra.gmra.mxu0 %vm53_vm1, %v212_v23 }
 0x262   :  { %v293_v25 = vpop.f32.mrf.mxu0 }
 0x263   :  { %v294_v26 = vadd.f32 %v318_v24, %v293_v25 }
 0x264   :  { %v367_v27 = vpop.f32.mrf.mxu0 }
 0x265   :  { %298 = vst.msk [vmem:[#allocation5] sm:$0xff] %vm297_vm2, %v294_v26 }
 0x266   :  { %405 = shalt.err (!%p402_p9)
}
 0x267   :  { %308 = dma.vmem_to_hbm [thread:$0]  %s306_s29, 128, %s519_s7, [#allocation4]  }
 0x268   :  { %416 = dma.done.wait [#allocation4], 128  }
 0x269   :  { %417 = vsyncadd [#allocation4], 4294967168 }
 0x26a   :  { %312 = vsyncpa [#allocation3], 1 }
 0x26b   :  { %313 = vsyncpa [#allocation4], 1 }

</bundles_post_ra>
